<compile_context>
chip_gen: v5e
topology: v5e:2x2
jax: 0.10.0
libtpu: 0.0.40
codegen_flags: <defaults>
</compile_context>

<pallas_src>
import math

import jax
import jax.numpy as jnp
from jax.experimental import pallas as pl
from jax.experimental.pallas import tpu as pltpu


# ----------------------------------------------------------------------------
# small helpers
# ----------------------------------------------------------------------------
def _round_up(x, m):
    return ((x + m - 1) // m) * m


def _pick_tile(dim_pad, target, align):
    """Largest tile <= target that is a multiple of `align` and divides dim_pad."""
    t = min(target, dim_pad)
    t = max(align, (t // align) * align)
    while dim_pad % t != 0:
        t -= align
    return t


def _compiler_params(**kwargs):
    cls = getattr(pltpu, "CompilerParams", None) or getattr(pltpu, "TPUCompilerParams", None)
    if cls is None:
        return None
    return cls(**kwargs)


# ----------------------------------------------------------------------------
# Pallas kernels
# ----------------------------------------------------------------------------
def _matmul_bias_kernel(x_ref, w_ref, b_ref, o_ref, acc_ref):
    # Tiled (tm,tk)x(tk,tn) matmul, accumulated over the K grid axis in a VMEM
    # f32 scratch; bias is added once, in the last-K epilogue only.
    k = pl.program_id(2)

    @pl.when(k == 0)
    def _init():
        acc_ref[...] = jnp.zeros_like(acc_ref)

    acc_ref[...] += jnp.dot(x_ref[...], w_ref[...],
                            preferred_element_type=jnp.float32)

    @pl.when(k == pl.num_programs(2) - 1)
    def _epilogue():
        o_ref[...] = (acc_ref[...] + b_ref[...]).astype(o_ref.dtype)


def _nearest2x_kernel(x_ref, dup_ref, o_ref):
    # x: (tb, W) rows, dup: (W, 2W) 0/1 duplication matrix -> lane-dense
    # column interleave on the MXU; row duplication via non-minor broadcast.
    up = jnp.dot(x_ref[...], dup_ref[...], preferred_element_type=jnp.float32)
    o_ref[...] = jnp.broadcast_to(up[:, None, :], o_ref.shape).astype(o_ref.dtype)


# ----------------------------------------------------------------------------
# Pallas wrappers
# ----------------------------------------------------------------------------
def _matmul_bias(patches, wmat, bias_row, *, tm_target=256, tn_target=256,
                 tk_target=512):
    """out[:M, :Ncols] = patches @ wmat + bias_row, tiled & pipelined."""
    M, K = patches.shape
    Kw, Ncols = wmat.shape
    assert K == Kw

    Mp = _round_up(M, tm_target) if M >= tm_target else _round_up(M, 8)
    Kp = _round_up(K, tk_target) if K >= tk_target else _round_up(K, 128)
    Np = _round_up(Ncols, tn_target) if Ncols >= tn_target else _round_up(Ncols, 128)

    tm = _pick_tile(Mp, tm_target, 8)
    tk = _pick_tile(Kp, tk_target, 128)
    tn = _pick_tile(Np, tn_target, 128)

    patches_p = jnp.pad(patches, ((0, Mp - M), (0, Kp - K)))
    wmat_p = jnp.pad(wmat, ((0, Kp - K), (0, Np - Ncols)))
    bias_p = jnp.pad(bias_row, ((0, 0), (0, Np - Ncols)))

    out = pl.pallas_call(
        _matmul_bias_kernel,
        out_shape=jax.ShapeDtypeStruct((Mp, Np), jnp.float32),
        grid_spec=pltpu.PrefetchScalarGridSpec(
            num_scalar_prefetch=0,
            grid=(Mp // tm, Np // tn, Kp // tk),
            in_specs=[
                pl.BlockSpec((tm, tk), lambda i, j, k: (i, k)),
                pl.BlockSpec((tk, tn), lambda i, j, k: (k, j)),
                pl.BlockSpec((1, tn), lambda i, j, k: (0, j)),
            ],
            out_specs=pl.BlockSpec((tm, tn), lambda i, j, k: (i, j)),
            scratch_shapes=[pltpu.VMEM((tm, tn), jnp.float32)],
        ),
        compiler_params=_compiler_params(
            dimension_semantics=("parallel", "parallel", "arbitrary")),
    )(patches_p, wmat_p, bias_p)
    return out[:M, :Ncols]


def _nearest_upsample_2x_nchw(x):
    """Nearest 2x upsample, NCHW-native (no transposes)."""
    N, C, H, W = x.shape
    R = N * C * H
    x2 = x.reshape(R, W)
    dup = jnp.repeat(jnp.eye(W, dtype=x.dtype), 2, axis=1)     # (W, 2W)

    Rp = _round_up(R, 8)
    tb = _pick_tile(Rp, 1024, 8)
    x2p = jnp.pad(x2, ((0, Rp - R), (0, 0)))

    out = pl.pallas_call(
        _nearest2x_kernel,
        out_shape=jax.ShapeDtypeStruct((Rp, 2, 2 * W), x.dtype),
        grid_spec=pltpu.PrefetchScalarGridSpec(
            num_scalar_prefetch=0,
            grid=(Rp // tb,),
            in_specs=[
                pl.BlockSpec((tb, W), lambda i: (i, 0)),
                pl.BlockSpec((W, 2 * W), lambda i: (0, 0)),
            ],
            out_specs=pl.BlockSpec((tb, 2, 2 * W), lambda i: (i, 0, 0)),
        ),
        compiler_params=_compiler_params(dimension_semantics=("parallel",)),
    )(x2p, dup)
    # (R, 2, 2W) row-major == (N, C, 2H, 2W) with y[..,2h+p,2w+q]=x[..,h,w]
    return out[:R].reshape(N, C, 2 * H, 2 * W)


def _upsample_conv_2x(x, weight, bias):
    """nearest-2x upsample + Conv2d(3x3, pad=1) via sub-pixel convolution."""
    N, C, H, W = x.shape
    Cout = weight.shape[0]

    x_nhwc = jnp.transpose(x, (0, 2, 3, 1))
    x_pad = jnp.pad(x_nhwc, ((0, 0), (1, 1), (1, 1), (0, 0)))

    # Standard 3x3 / pad-1 im2col on the ORIGINAL (small) grid: (M, 9C).
    taps = [x_pad[:, s:s + H, t:t + W, :] for s in range(3) for t in range(3)]
    patches = jnp.stack(taps, axis=3).reshape(N * H * W, 9 * C)

    # Sub-pixel weights: y[n, 2h+pi, 2w+pj] = 3x3 conv(x, W_eq[pi,pj]) where
    # W_eq[pi,pj][s,t] = sum_{kh,kw} M[pi,s,kh] * M[pj,t,kw] * W[kh,kw].
    wk = jnp.transpose(weight, (2, 3, 1, 0))                    # (kh,kw,Cin,Cout)
    m = jnp.array([[[1., 0., 0.], [0., 1., 1.], [0., 0., 0.]],
                   [[0., 0., 0.], [1., 1., 0.], [0., 0., 1.]]],
                  dtype=weight.dtype)                           # (pi, s, kh)
    w_eq = jnp.einsum('isk,jtl,klcd->stcijd', m, m, wk)         # (3,3,C,2,2,Cout)
    w_all = w_eq.reshape(9 * C, 4 * Cout)
    b_all = jnp.tile(bias, 4).reshape(1, 4 * Cout)

    out = _matmul_bias(patches, w_all, b_all)                   # (M, 4*Cout)

    # depth-to-space: (n,h,w,pi,pj,c) -> (n, 2h+pi, 2w+pj, c) -> NCHW
    out = out.reshape(N, H, W, 2, 2, Cout)
    y = jnp.transpose(out, (0, 1, 3, 2, 4, 5)).reshape(N, 2 * H, 2 * W, Cout)
    return jnp.transpose(y, (0, 3, 1, 2))


_nearest_upsample_2x_nchw = jax.jit(_nearest_upsample_2x_nchw)
_upsample_conv_2x = jax.jit(_upsample_conv_2x)


# ----------------------------------------------------------------------------
# Upsample module (JAX / Pallas)
# ----------------------------------------------------------------------------
class Upsample:
    """Pallas port of the PyTorch Upsample module (dims=2 only).

    forward: x -> nearest 2x upsample -> [Conv2d(channels, out_channels, 3, pad=1)]
    """

    def __init__(self, channels, use_conv, dims=2, out_channels=None, *, key=None):
        assert dims == 2, "only the 2-D variant is implemented"
        # TODO(synk): dims=1 and dims=3 interpolate variants not implemented here.
        self.channels = channels
        self.out_channels = out_channels or channels
        self.use_conv = use_conv
        self.dims = dims
        self.name = "upsample"

        if use_conv:
            if key is None:
                key = jax.random.PRNGKey(0)
            k_w, k_b = jax.random.split(key)
            fan_in = channels * 3 * 3
            bound = 1.0 / math.sqrt(fan_in)
            # PyTorch Conv2d weight layout: (Cout, Cin, kh, kw)
            self.weight = jax.random.uniform(
                k_w, (self.out_channels, channels, 3, 3),
                minval=-bound, maxval=bound, dtype=jnp.float32)
            self.bias = jax.random.uniform(
                k_b, (self.out_channels,),
                minval=-bound, maxval=bound, dtype=jnp.float32)
        else:
            self.weight = None
            self.bias = None

    def __call__(self, x):
        # x: (N, C, H, W) float32, NCHW like PyTorch
        assert x.shape[1] == self.channels
        if self.use_conv:
            return _upsample_conv_2x(x, self.weight, self.bias)
        return _nearest_upsample_2x_nchw(x)


# ----------------------------------------------------------------------------
# Reference implementations (plain JAX) for verification
# ----------------------------------------------------------------------------
def _ref_nearest2x(x):
    return jnp.repeat(jnp.repeat(x, 2, axis=2), 2, axis=3)


def _ref_upsample_conv(x, weight, bias):
    x_up = _ref_nearest2x(x)
    y = jax.lax.conv_general_dilated(
        x_up, weight, window_strides=(1, 1), padding=((1, 1), (1, 1)),
        dimension_numbers=("NCHW", "OIHW", "NCHW"))
    return y + bias[None, :, None, None]


# ----------------------------------------------------------------------------
if __name__ == "__main__":
    key = jax.random.PRNGKey(0)
    k_x, k_p = jax.random.split(key)

    N, C, H, W = 2, 4, 16, 16
    Cout = 8
    x = jax.random.normal(k_x, (N, C, H, W), dtype=jnp.float32)

    # use_conv=True: nearest 2x upsample -> Conv2d(3x3, pad=1)
    up_conv = Upsample(C, use_conv=True, dims=2, out_channels=Cout, key=k_p)
    y_conv = jax.block_until_ready(up_conv(x))
    y_conv_ref = _ref_upsample_conv(x, up_conv.weight, up_conv.bias)
    assert y_conv.shape == (N, Cout, 2 * H, 2 * W), y_conv.shape
    assert jnp.allclose(y_conv, y_conv_ref, atol=1e-4, rtol=1e-4), \
        float(jnp.max(jnp.abs(y_conv - y_conv_ref)))

    # use_conv=False: pure nearest 2x upsample
    up_plain = Upsample(C, use_conv=False, dims=2)
    y_plain = jax.block_until_ready(up_plain(x))
    y_plain_ref = _ref_nearest2x(x)
    assert y_plain.shape == (N, C, 2 * H, 2 * W), y_plain.shape
    assert jnp.allclose(y_plain, y_plain_ref, atol=1e-5, rtol=1e-5)

    print("KERNEL_OK")
</pallas_src>

<mosaic_0001>
module attributes {stable_mosaic.version = 11 : i64} {
  func.func @_matmul_bias_kernel(%arg0: i32, %arg1: i32, %arg2: i32, %arg3: memref<256x128xf32, #tpu.memory_space<vmem>>, %arg4: memref<128x128xf32, #tpu.memory_space<vmem>>, %arg5: memref<1x128xf32, #tpu.memory_space<vmem>>, %arg6: memref<256x128xf32, #tpu.memory_space<vmem>>, %arg7: memref<256x128xf32, #tpu.memory_space<vmem>>) attributes {dimension_semantics = [#tpu.dimension_semantics<parallel>, #tpu.dimension_semantics<parallel>, #tpu.dimension_semantics<arbitrary>], iteration_bounds = array<i64: 2, 1, 1>, scalar_prefetch = 0 : i64, scratch_operands = 1 : i64, tpu.core_type = #tpu.core_type<tc>, window_params = [{transform_indices = @transform_0, window_bounds = array<i64: 256, 128>}, {transform_indices = @transform_1, window_bounds = array<i64: 128, 128>}, {transform_indices = @transform_2, window_bounds = array<i64: 1, 128>}, {transform_indices = @transform_3, window_bounds = array<i64: 256, 128>}]} {
    %c0_i32 = arith.constant 0 : i32
    %0 = arith.cmpi eq, %arg2, %c0_i32 : i32
    %1 = arith.extui %0 : i1 to i32
    %c0_i32_0 = arith.constant 0 : i32
    %2 = arith.cmpi ne, %1, %c0_i32_0 : i32
    scf.if %2 {
      %cst_10 = arith.constant 0.000000e+00 : f32
      %12 = vector.broadcast %cst_10 : f32 to vector<256x128xf32>
      %c0_11 = arith.constant 0 : index
      %c0_12 = arith.constant 0 : index
      %13 = vector.load %arg7[%c0_11, %c0_12] : memref<256x128xf32, #tpu.memory_space<vmem>>, vector<256x128xf32>
      tpu.vector_store %arg7[%c0_11, %c0_12], %12 {strides = array<i32>} : memref<256x128xf32, #tpu.memory_space<vmem>>, vector<256x128xf32>,
    } else {
    }
    %c0 = arith.constant 0 : index
    %c0_1 = arith.constant 0 : index
    %3 = vector.load %arg7[%c0, %c0_1] : memref<256x128xf32, #tpu.memory_space<vmem>>, vector<256x128xf32>
    %c0_2 = arith.constant 0 : index
    %c0_3 = arith.constant 0 : index
    %4 = vector.load %arg3[%c0_2, %c0_3] : memref<256x128xf32, #tpu.memory_space<vmem>>, vector<256x128xf32>
    %c0_4 = arith.constant 0 : index
    %c0_5 = arith.constant 0 : index
    %5 = vector.load %arg4[%c0_4, %c0_5] : memref<128x128xf32, #tpu.memory_space<vmem>>, vector<128x128xf32>
    %cst = arith.constant dense<0.000000e+00> : vector<256x128xf32>
    %6 = tpu.matmul %4, %5, %cst {dimension_numbers = #tpu.dot_dimension_numbers<[1], [0], [0], [1], [0, 0, 1, 1], [], []>} : vector<256x128xf32>, vector<128x128xf32>, vector<256x128xf32> -> vector<256x128xf32>
    %7 = arith.addf %3, %6 : vector<256x128xf32>
    %c0_6 = arith.constant 0 : index
    %c0_7 = arith.constant 0 : index
    %8 = vector.load %arg7[%c0_6, %c0_7] : memref<256x128xf32, #tpu.memory_space<vmem>>, vector<256x128xf32>
    tpu.vector_store %arg7[%c0_6, %c0_7], %7 {strides = array<i32>} : memref<256x128xf32, #tpu.memory_space<vmem>>, vector<256x128xf32>,
    %c0_i32_8 = arith.constant 0 : i32
    %9 = arith.cmpi eq, %arg2, %c0_i32_8 : i32
    %10 = arith.extui %9 : i1 to i32
    %c0_i32_9 = arith.constant 0 : i32
    %11 = arith.cmpi ne, %10, %c0_i32_9 : i32
    scf.if %11 {
      %c0_10 = arith.constant 0 : index
      %c0_11 = arith.constant 0 : index
      %12 = vector.load %arg7[%c0_10, %c0_11] : memref<256x128xf32, #tpu.memory_space<vmem>>, vector<256x128xf32>
      %c0_12 = arith.constant 0 : index
      %c0_13 = arith.constant 0 : index
      %13 = vector.load %arg5[%c0_12, %c0_13] : memref<1x128xf32, #tpu.memory_space<vmem>>, vector<1x128xf32>
      %14 = vector.broadcast %13 : vector<1x128xf32> to vector<256x128xf32>
      %15 = arith.addf %12, %14 : vector<256x128xf32>
      %c0_14 = arith.constant 0 : index
      %c0_15 = arith.constant 0 : index
      %16 = vector.load %arg6[%c0_14, %c0_15] : memref<256x128xf32, #tpu.memory_space<vmem>>, vector<256x128xf32>
      tpu.vector_store %arg6[%c0_14, %c0_15], %15 {strides = array<i32>} : memref<256x128xf32, #tpu.memory_space<vmem>>, vector<256x128xf32>,
    } else {
    }
    return
  }
  func.func @transform_0(%arg0: i32, %arg1: i32, %arg2: i32) -> (i32, i32) {
    %c0_i32 = arith.constant 0 : i32
    return %arg0, %arg2 : i32, i32
  }
  func.func @transform_1(%arg0: i32, %arg1: i32, %arg2: i32) -> (i32, i32) {
    %c0_i32 = arith.constant 0 : i32
    return %arg2, %arg1 : i32, i32
  }
  func.func @transform_2(%arg0: i32, %arg1: i32, %arg2: i32) -> (i32, i32) {
    %c0_i32 = arith.constant 0 : i32
    %c0_i32_0 = arith.constant 0 : i32
    return %c0_i32, %arg1 : i32, i32
  }
  func.func @transform_3(%arg0: i32, %arg1: i32, %arg2: i32) -> (i32, i32) {
    %c0_i32 = arith.constant 0 : i32
    return %arg0, %arg1 : i32, i32
  }
}

</mosaic_0001>

<bundles_post_ra>
// kernel: tile.8
= control target key start
LH: loop header
LB: loop body
LE: loop exit
PB: predicated region body
PF: predicated region fallthrough
CT: control target
= control target key end

     0   :  { %s22_s0 = inlined_call_operand.vmem [shape: f32[8], index: 0, kind: input, shape index: {}]   ;;  %s23_s1 = inlined_call_operand.vmem [shape: f32[4,8], index: 1, kind: output, shape index: {}]  }
   0x1   :  { %v4_v0 = vld [vmem:[%s22_s0] ss:$0 sm:$0xff] }
   0x2   :  { %5 = vst [vmem:[%s23_s1] sm:$0xf] %v4_v0 }

// kernel: tile.9
= control target key start
LH: loop header
LB: loop body
LE: loop exit
PB: predicated region body
PF: predicated region fallthrough
CT: control target
= control target key end

     0   :  { %s37_s8 = smov 8   ;;  %s38_s9 = smov 16   ;;  %vm7_vm0 = vcmask 64512   ;;  %vm13_vm1 = vcmask 261312   ;;  %vm19_vm2 = vcmask 195712   ;;  %vm25_vm3 = vcmask 130112   ;;  %s55_s0 = inlined_call_operand.vmem [shape: f32[4,8], index: 0, kind: input, shape index: {}]   ;;  %s56_s1 = inlined_call_operand.vmem [shape: f32[1,32], index: 1, kind: output, shape index: {}]  }
   0x1   :  { %v4_v0 = vld [vmem:[%s55_s0] sm:$0xf]  ;;  %s36_s0 = smov 24  }
   0x2   :  { %5 = vst [vmem:[#allocation1] sm:$0xf] %v4_v0 }
   0x9   :  { %v10_v1 = vld [vmem:[#allocation1 + $0x3] sm:$0x1]   ;;  %v22_v2 = vld [vmem:[#allocation1 + $0x1] sm:$0x1]   ;;  %v16_v3 = vld [vmem:[#allocation1 + $0x2] sm:$0x1]  }
   0xa   :  { %11 = vrot.lane.b32.xlu0 %v10_v1, %s36_s0  ;;  %23 = vrot.lane.b32.xlu1 %v22_v2, %s37_s8  ;;  %v6_v4 = vld [vmem:[#allocation1] sm:$0x1]  }
   0xb   :  { %8 = vst.msk [vmem:[#allocation0] sm:$0x1] %vm7_vm0, %v6_v4  }
  0x12   :  { %17 = vrot.lane.b32.xlu0 %v16_v3, %s38_s9 }
  0x7c   :  { %v12_v5 = vpop.permute.xlu0 %11   ;;  %v24_v6 = vpop.permute.xlu1 %23  }
  0x7d   :  { %14 = vst.msk [vmem:[#allocation0] sm:$0x1] %vm13_vm1, %v12_v5  }
  0x84   :  { %v18_v7 = vpop.permute.xlu0 %17  }
  0x85   :  { %20 = vst.msk [vmem:[#allocation0] sm:$0x1] %vm19_vm2, %v18_v7  }
  0x86   :  { %26 = vst.msk [vmem:[#allocation0] sm:$0x1] %vm25_vm3, %v24_v6  }
  0x8d   :  { %v29_v8 = vld [vmem:[#allocation0] sm:$0x1] }
  0x8e   :  { %32 = vst [vmem:[%s56_s1] sm:$0x1] %v29_v8 }

// kernel: _upsample_conv_2x.1
= control target key start
LH: loop header
LB: loop body
LE: loop exit
PB: predicated region body
PF: predicated region fallthrough
CT: control target
= control target key end

     0   :  { %s896_s12 = smov 0   ;;  %s898_s13 = smov 0   ;;  %s1092_s0 = inlined_call_operand.vmem [shape: f32[512,128], index: 0, kind: input, shape index: {}]   ;;  %s1093_s1 = inlined_call_operand.vmem [shape: f32[128,128], index: 1, kind: input, shape index: {}]   ;;  %s1094_s2 = inlined_call_operand.vmem [shape: f32[1,128], index: 2, kind: input, shape index: {}]   ;;  %s1095_s3 = inlined_call_operand.vmem [shape: f32[512,128], index: 3, kind: output, shape index: {}]  }
   0x1   :  { %s900_s14 = smov 0  }
   0x2 LB: > { %s32_s15 = sadd.s32 1, %s870_s13  ;;  %p772_p0 = scmp.ge.s32.totalorder %s874_s14, 1  ;;  %s874_s14 = sphi %s900_s14, %s13_s14   ;;  %s870_s13 = sphi %s898_s13, %s1097_s13   ;;  %s866_s12 = sphi %s896_s12, %s1096_s12  }
   0x3   : > { %p34_p1 = scmp.ge.s32.totalorder %s32_s15, 2  ;;  %p188_p2 = scmp.lt.s32.totalorder %s874_s14, 3 }
   0x5   : > { %s1099_s15 = smov (%p34_p1, %s32_s15), 0  ;;  %p189_p3 = pnand %p772_p0, %p188_p2 }
   0x6   : > { %s773_s5 = sshll.u32 (!%p189_p3), %s866_s12, 5 }
   0x7   : > { %192 = sbr.rel (%p189_p3) target bundleno = 236 (0xec), region = 32  ;;  %p230_p4 = scmp.lt.s32.totalorder (!%p189_p3), %s773_s5, 63 }
   0xc   : > { %v374_v0 = vld [vmem:[%s1093_s1 + $0x78] sm:$0xff]  ;;  %v373_v1 = vld [vmem:[%s1093_s1 + $0x70] sm:$0xff]  ;;  %v372_v2 = vld [vmem:[%s1093_s1 + $0x68] sm:$0xff]  ;;  %s1101_s5 = smov (!%p230_p4, %s773_s5), 63 }
   0xd   : > { %780 = vmatpush.msra.mxu2 %v374_v0  ;;  %781 = vmatpush.msra.mxu3 %v374_v0  ;;  %v371_v3 = vld [vmem:[%s1093_s1 + $0x60] sm:$0xff]  ;;  %v370_v4 = vld [vmem:[%s1093_s1 + $0x58] sm:$0xff]  ;;  %v369_v5 = vld [vmem:[%s1093_s1 + $0x50] sm:$0xff]  ;;  %s774_s19 = sshll.u32 %s1101_s5, 3 }
   0xe   : > { %375 = vmatpush.msra.mxu0 %v374_v0  ;;  %779 = vmatpush.msra.mxu1 %v374_v0  ;;  %v368_v6 = vld [vmem:[%s1093_s1 + $0x48] sm:$0xff]  ;;  %v367_v7 = vld [vmem:[%s1093_s1 + $0x40] sm:$0xff]  ;;  %v366_v8 = vld [vmem:[%s1093_s1 + $0x38] sm:$0xff]  ;;  %s970_s26 = scalar_lea.vmem %s1092_s0, %s774_s19  ;;  %s1017_s7 = scalar_lea.vmem %s1095_s3, %s774_s19 }
   0xf   : > { %783 = vmatpush.msra.mxu2 %v373_v1  ;;  %784 = vmatpush.msra.mxu3 %v373_v1  ;;  %v365_v9 = vld [vmem:[%s1093_s1 + $0x30] sm:$0xff]  ;;  %v364_v10 = vld [vmem:[%s1093_s1 + $0x28] sm:$0xff]  ;;  %v363_v11 = vld [vmem:[%s1093_s1 + $0x20] sm:$0xff] }
  0x10   : > { %376 = vmatpush.msra.mxu0 %v373_v1  ;;  %782 = vmatpush.msra.mxu1 %v373_v1  ;;  %v362_v12 = vld [vmem:[%s1093_s1 + $0x18] sm:$0xff]  ;;  %v361_v13 = vld [vmem:[%s1093_s1 + $0x10] sm:$0xff]  ;;  %v360_v14 = vld [vmem:[%s1093_s1 + $0x8] sm:$0xff] }
  0x11   : > { %786 = vmatpush.msra.mxu2 %v372_v2  ;;  %787 = vmatpush.msra.mxu3 %v372_v2  ;;  %v359_v15 = vld [vmem:[%s1093_s1] sm:$0xff]  ;;  %v344_v20 = vld [vmem:[%s970_s26 + $0x88] sm:$0xff]  ;;  %v345_v24 = vld [vmem:[%s970_s26 + $0x90] sm:$0xff] }
  0x12   : > { %377 = vmatpush.msra.mxu0 %v372_v2  ;;  %785 = vmatpush.msra.mxu1 %v372_v2  ;;  %v343_v16 = vld [vmem:[%s970_s26 + $0x80] sm:$0xff]  ;;  %v352_v21 = vld [vmem:[%s970_s26 + $0xc8] sm:$0xff]  ;;  %v353_v25 = vld [vmem:[%s970_s26 + $0xd0] sm:$0xff] }
  0x13   : > { %789 = vmatpush.msra.mxu2 %v371_v3  ;;  %790 = vmatpush.msra.mxu3 %v371_v3  ;;  %v351_v17 = vld [vmem:[%s970_s26 + $0xc0] sm:$0xff]  ;;  %v328_v22 = vld [vmem:[%s970_s26 + $0x8] sm:$0xff]  ;;  %v329_v26 = vld [vmem:[%s970_s26 + $0x10] sm:$0xff] }
  0x14   : > { %378 = vmatpush.msra.mxu0 %v371_v3  ;;  %788 = vmatpush.msra.mxu1 %v371_v3  ;;  %v327_v18 = vld [vmem:[%s970_s26] sm:$0xff]  ;;  %v336_v23 = vld [vmem:[%s970_s26 + $0x48] sm:$0xff]  ;;  %v337_v27 = vld [vmem:[%s970_s26 + $0x50] sm:$0xff] }
  0x15   : > { %792 = vmatpush.msra.mxu2 %v370_v4  ;;  %793 = vmatpush.msra.mxu3 %v370_v4  ;;  %v335_v19 = vld [vmem:[%s970_s26 + $0x40] sm:$0xff]  ;;  %v346_v28 = vld [vmem:[%s970_s26 + $0x98] sm:$0xff]  ;;  %v348_v36 = vld [vmem:[%s970_s26 + $0xa8] sm:$0xff] }
  0x16   : > { %379 = vmatpush.msra.mxu0 %v370_v4  ;;  %791 = vmatpush.msra.mxu1 %v370_v4  ;;  %v354_v29 = vld [vmem:[%s970_s26 + $0xd8] sm:$0xff]  ;;  %v347_v32 = vld [vmem:[%s970_s26 + $0xa0] sm:$0xff]  ;;  %v356_v37 = vld [vmem:[%s970_s26 + $0xe8] sm:$0xff] }
  0x17   : > { %795 = vmatpush.msra.mxu2 %v369_v5  ;;  %796 = vmatpush.msra.mxu3 %v369_v5  ;;  %v330_v30 = vld [vmem:[%s970_s26 + $0x18] sm:$0xff]  ;;  %v355_v33 = vld [vmem:[%s970_s26 + $0xe0] sm:$0xff]  ;;  %v332_v38 = vld [vmem:[%s970_s26 + $0x28] sm:$0xff] }
  0x18   : > { %380 = vmatpush.msra.mxu0 %v369_v5  ;;  %794 = vmatpush.msra.mxu1 %v369_v5  ;;  %v338_v31 = vld [vmem:[%s970_s26 + $0x58] sm:$0xff]  ;;  %v331_v34 = vld [vmem:[%s970_s26 + $0x20] sm:$0xff]  ;;  %v340_v39 = vld [vmem:[%s970_s26 + $0x68] sm:$0xff] }
  0x19   : > { %798 = vmatpush.msra.mxu2 %v368_v6  ;;  %799 = vmatpush.msra.mxu3 %v368_v6  ;;  %v339_v35 = vld [vmem:[%s970_s26 + $0x60] sm:$0xff]  ;;  %v349_v40 = vld [vmem:[%s970_s26 + $0xb0] sm:$0xff]  ;;  %v350_v44 = vld [vmem:[%s970_s26 + $0xb8] sm:$0xff] }
  0x1a   : > { %381 = vmatpush.msra.mxu0 %v368_v6  ;;  %797 = vmatpush.msra.mxu1 %v368_v6  ;;  %v357_v41 = vld [vmem:[%s970_s26 + $0xf0] sm:$0xff]  ;;  %v358_v45 = vld [vmem:[%s970_s26 + $0xf8] sm:$0xff]  ;;  %v1010_v48 = vld [vmem:[%s1094_s2] ss:$0 sm:$0xff] }
  0x1b   : > { %801 = vmatpush.msra.mxu2 %v367_v7  ;;  %802 = vmatpush.msra.mxu3 %v367_v7  ;;  %v333_v42 = vld [vmem:[%s970_s26 + $0x30] sm:$0xff]  ;;  %v334_v46 = vld [vmem:[%s970_s26 + $0x38] sm:$0xff] }
  0x1c   : > { %382 = vmatpush.msra.mxu0 %v367_v7  ;;  %800 = vmatpush.msra.mxu1 %v367_v7  ;;  %v341_v43 = vld [vmem:[%s970_s26 + $0x70] sm:$0xff]  ;;  %v342_v47 = vld [vmem:[%s970_s26 + $0x78] sm:$0xff] }
  0x1d   : > { %804 = vmatpush.msra.mxu2 %v366_v8  ;;  %805 = vmatpush.msra.mxu3 %v366_v8 }
  0x1e   : > { %383 = vmatpush.msra.mxu0 %v366_v8  ;;  %803 = vmatpush.msra.mxu1 %v366_v8 }
  0x1f   : > { %807 = vmatpush.msra.mxu2 %v365_v9  ;;  %808 = vmatpush.msra.mxu3 %v365_v9 }
  0x20   : > { %384 = vmatpush.msra.mxu0 %v365_v9  ;;  %806 = vmatpush.msra.mxu1 %v365_v9 }
  0x21   : > { %810 = vmatpush.msra.mxu2 %v364_v10  ;;  %811 = vmatpush.msra.mxu3 %v364_v10 }
  0x22   : > { %385 = vmatpush.msra.mxu0 %v364_v10  ;;  %809 = vmatpush.msra.mxu1 %v364_v10 }
  0x23   : > { %813 = vmatpush.msra.mxu2 %v363_v11  ;;  %814 = vmatpush.msra.mxu3 %v363_v11 }
  0x24   : > { %386 = vmatpush.msra.mxu0 %v363_v11  ;;  %812 = vmatpush.msra.mxu1 %v363_v11 }
  0x25   : > { %816 = vmatpush.msra.mxu2 %v362_v12  ;;  %817 = vmatpush.msra.mxu3 %v362_v12 }
  0x26   : > { %387 = vmatpush.msra.mxu0 %v362_v12  ;;  %815 = vmatpush.msra.mxu1 %v362_v12 }
  0x27   : > { %819 = vmatpush.msra.mxu2 %v361_v13  ;;  %820 = vmatpush.msra.mxu3 %v361_v13 }
  0x28   : > { %388 = vmatpush.msra.mxu0 %v361_v13  ;;  %818 = vmatpush.msra.mxu1 %v361_v13 }
  0x29   : > { %822 = vmatpush.msra.mxu2 %v360_v14  ;;  %823 = vmatpush.msra.mxu3 %v360_v14 }
  0x2a   : > { %389 = vmatpush.msra.mxu0 %v360_v14  ;;  %821 = vmatpush.msra.mxu1 %v360_v14 }
  0x2b   : > { %825 = vmatpush.msra.mxu2 %v359_v15  ;;  %826 = vmatpush.msra.mxu3 %v359_v15 }
  0x2c   : > { %439 = vmatmul.f32.vlgmr.msra.gmra.mxu2 %v343_v16  ;;  %463 = vmatmul.f32.vlgmr.msra.gmra.mxu3 %v351_v17 }
  0x2d   : > { %390 = vmatpush.msra.mxu0 %v359_v15  ;;  %824 = vmatpush.msra.mxu1 %v359_v15 }
  0x2e   : > { %391 = vmatmul.f32.vlgmr.msra.gmra.mxu0 %v327_v18  ;;  %415 = vmatmul.f32.vlgmr.msra.gmra.mxu1 %v335_v19 }
  0x34   : > { %442 = vmatmul.f32.gmra.mxu2 %v344_v20  ;;  %466 = vmatmul.f32.gmra.mxu3 %v352_v21 }
  0x36   : > { %394 = vmatmul.f32.gmra.mxu0 %v328_v22  ;;  %418 = vmatmul.f32.gmra.mxu1 %v336_v23 }
  0x3c   : > { %445 = vmatmul.f32.gmra.mxu2 %v345_v24  ;;  %469 = vmatmul.f32.gmra.mxu3 %v353_v25 }
  0x3e   : > { %397 = vmatmul.f32.gmra.mxu0 %v329_v26  ;;  %421 = vmatmul.f32.gmra.mxu1 %v337_v27 }
  0x44   : > { %448 = vmatmul.f32.gmra.mxu2 %v346_v28  ;;  %472 = vmatmul.f32.gmra.mxu3 %v354_v29 }
  0x46   : > { %400 = vmatmul.f32.gmra.mxu0 %v330_v30  ;;  %424 = vmatmul.f32.gmra.mxu1 %v338_v31 }
  0x4c   : > { %451 = vmatmul.f32.gmra.mxu2 %v347_v32  ;;  %475 = vmatmul.f32.gmra.mxu3 %v355_v33 }
  0x4e   : > { %403 = vmatmul.f32.gmra.mxu0 %v331_v34  ;;  %427 = vmatmul.f32.gmra.mxu1 %v339_v35 }
  0x54   : > { %454 = vmatmul.f32.gmra.mxu2 %v348_v36  ;;  %478 = vmatmul.f32.gmra.mxu3 %v356_v37 }
  0x56   : > { %406 = vmatmul.f32.gmra.mxu0 %v332_v38  ;;  %430 = vmatmul.f32.gmra.mxu1 %v340_v39 }
  0x5c   : > { %457 = vmatmul.f32.gmra.mxu2 %v349_v40  ;;  %481 = vmatmul.f32.gmra.mxu3 %v357_v41 }
  0x5e   : > { %409 = vmatmul.f32.gmra.mxu0 %v333_v42  ;;  %433 = vmatmul.f32.gmra.mxu1 %v341_v43 }
  0x64   : > { %460 = vmatmul.f32.gmra.mxu2 %v350_v44  ;;  %484 = vmatmul.f32.gmra.mxu3 %v358_v45 }
  0x66   : > { %412 = vmatmul.f32.gmra.mxu0 %v334_v46  ;;  %436 = vmatmul.f32.gmra.mxu1 %v342_v47 }
  0xab   : > { %v392_v49 = vpop.f32.mrf.mxu0  ;;  %v416_v50 = vpop.f32.mrf.mxu1 }
  0xac   : > { %v591_v51 = vadd.f32 %v1010_v48, %v392_v49  ;;  %v599_v52 = vadd.f32 %v1010_v48, %v416_v50 }
  0xae   : > { %623 = vst [vmem:[%s1017_s7] sm:$0xff] %v591_v51 }
  0xaf   : > { %631 = vst [vmem:[%s1017_s7 + $0x40] sm:$0xff] %v599_v52  ;;  %v440_v53 = vpop.f32.mrf.mxu2  ;;  %v464_v54 = vpop.f32.mrf.mxu3 }
  0xb0   : > { %v607_v55 = vadd.f32 %v1010_v48, %v440_v53  ;;  %v615_v56 = vadd.f32 %v1010_v48, %v464_v54 }
  0xb2   : > { %639 = vst [vmem:[%s1017_s7 + $0x80] sm:$0xff] %v607_v55 }
  0xb3   : > { %647 = vst [vmem:[%s1017_s7 + $0xc0] sm:$0xff] %v615_v56  ;;  %v395_v57 = vpop.f32.mrf.mxu0  ;;  %v419_v58 = vpop.f32.mrf.mxu1 }
  0xb4   : > { %v592_v59 = vadd.f32 %v1010_v48, %v395_v57  ;;  %v600_v60 = vadd.f32 %v1010_v48, %v419_v58 }
  0xb6   : > { %624 = vst [vmem:[%s1017_s7 + $0x8] sm:$0xff] %v592_v59 }
  0xb7   : > { %632 = vst [vmem:[%s1017_s7 + $0x48] sm:$0xff] %v600_v60  ;;  %v443_v61 = vpop.f32.mrf.mxu2  ;;  %v467_v62 = vpop.f32.mrf.mxu3 }
  0xb8   : > { %v608_v63 = vadd.f32 %v1010_v48, %v443_v61  ;;  %v616_v0 = vadd.f32 %v1010_v48, %v467_v62 }
  0xba   : > { %640 = vst [vmem:[%s1017_s7 + $0x88] sm:$0xff] %v608_v63 }
  0xbb   : > { %648 = vst [vmem:[%s1017_s7 + $0xc8] sm:$0xff] %v616_v0  ;;  %v398_v1 = vpop.f32.mrf.mxu0  ;;  %v422_v2 = vpop.f32.mrf.mxu1 }
  0xbc   : > { %v593_v3 = vadd.f32 %v1010_v48, %v398_v1  ;;  %v601_v4 = vadd.f32 %v1010_v48, %v422_v2 }
  0xbe   : > { %625 = vst [vmem:[%s1017_s7 + $0x10] sm:$0xff] %v593_v3 }
  0xbf   : > { %633 = vst [vmem:[%s1017_s7 + $0x50] sm:$0xff] %v601_v4  ;;  %v446_v5 = vpop.f32.mrf.mxu2  ;;  %v470_v6 = vpop.f32.mrf.mxu3 }
  0xc0   : > { %v609_v7 = vadd.f32 %v1010_v48, %v446_v5  ;;  %v617_v8 = vadd.f32 %v1010_v48, %v470_v6 }
  0xc2   : > { %641 = vst [vmem:[%s1017_s7 + $0x90] sm:$0xff] %v609_v7 }
  0xc3   : > { %649 = vst [vmem:[%s1017_s7 + $0xd0] sm:$0xff] %v617_v8  ;;  %v401_v9 = vpop.f32.mrf.mxu0  ;;  %v425_v10 = vpop.f32.mrf.mxu1 }
  0xc4   : > { %v594_v11 = vadd.f32 %v1010_v48, %v401_v9  ;;  %v602_v12 = vadd.f32 %v1010_v48, %v425_v10 }
  0xc6   : > { %626 = vst [vmem:[%s1017_s7 + $0x18] sm:$0xff] %v594_v11 }
  0xc7   : > { %634 = vst [vmem:[%s1017_s7 + $0x58] sm:$0xff] %v602_v12  ;;  %v449_v13 = vpop.f32.mrf.mxu2  ;;  %v473_v14 = vpop.f32.mrf.mxu3 }
  0xc8   : > { %v610_v15 = vadd.f32 %v1010_v48, %v449_v13  ;;  %v618_v16 = vadd.f32 %v1010_v48, %v473_v14 }
  0xca   : > { %642 = vst [vmem:[%s1017_s7 + $0x98] sm:$0xff] %v610_v15 }
  0xcb   : > { %650 = vst [vmem:[%s1017_s7 + $0xd8] sm:$0xff] %v618_v16  ;;  %v404_v17 = vpop.f32.mrf.mxu0  ;;  %v428_v18 = vpop.f32.mrf.mxu1 }
  0xcc   : > { %v595_v19 = vadd.f32 %v1010_v48, %v404_v17  ;;  %v603_v20 = vadd.f32 %v1010_v48, %v428_v18 }
  0xce   : > { %627 = vst [vmem:[%s1017_s7 + $0x20] sm:$0xff] %v595_v19 }
  0xcf   : > { %635 = vst [vmem:[%s1017_s7 + $0x60] sm:$0xff] %v603_v20  ;;  %v452_v21 = vpop.f32.mrf.mxu2  ;;  %v476_v22 = vpop.f32.mrf.mxu3 }
  0xd0   : > { %v611_v23 = vadd.f32 %v1010_v48, %v452_v21  ;;  %v619_v24 = vadd.f32 %v1010_v48, %v476_v22 }
  0xd2   : > { %643 = vst [vmem:[%s1017_s7 + $0xa0] sm:$0xff] %v611_v23 }
  0xd3   : > { %651 = vst [vmem:[%s1017_s7 + $0xe0] sm:$0xff] %v619_v24  ;;  %v407_v25 = vpop.f32.mrf.mxu0  ;;  %v431_v26 = vpop.f32.mrf.mxu1 }
  0xd4   : > { %v596_v27 = vadd.f32 %v1010_v48, %v407_v25  ;;  %v604_v28 = vadd.f32 %v1010_v48, %v431_v26 }
  0xd6   : > { %628 = vst [vmem:[%s1017_s7 + $0x28] sm:$0xff] %v596_v27 }
  0xd7   : > { %636 = vst [vmem:[%s1017_s7 + $0x68] sm:$0xff] %v604_v28  ;;  %v455_v29 = vpop.f32.mrf.mxu2  ;;  %v479_v30 = vpop.f32.mrf.mxu3 }
  0xd8   : > { %v612_v31 = vadd.f32 %v1010_v48, %v455_v29  ;;  %v620_v32 = vadd.f32 %v1010_v48, %v479_v30 }
  0xda   : > { %644 = vst [vmem:[%s1017_s7 + $0xa8] sm:$0xff] %v612_v31 }
  0xdb   : > { %652 = vst [vmem:[%s1017_s7 + $0xe8] sm:$0xff] %v620_v32  ;;  %v410_v33 = vpop.f32.mrf.mxu0  ;;  %v434_v34 = vpop.f32.mrf.mxu1 }
  0xdc   : > { %v597_v35 = vadd.f32 %v1010_v48, %v410_v33  ;;  %v605_v36 = vadd.f32 %v1010_v48, %v434_v34 }
  0xde   : > { %629 = vst [vmem:[%s1017_s7 + $0x30] sm:$0xff] %v597_v35 }
  0xdf   : > { %637 = vst [vmem:[%s1017_s7 + $0x70] sm:$0xff] %v605_v36  ;;  %v458_v37 = vpop.f32.mrf.mxu2  ;;  %v482_v38 = vpop.f32.mrf.mxu3 }
  0xe0   : > { %v613_v39 = vadd.f32 %v1010_v48, %v458_v37  ;;  %v621_v40 = vadd.f32 %v1010_v48, %v482_v38 }
  0xe2   : > { %645 = vst [vmem:[%s1017_s7 + $0xb0] sm:$0xff] %v613_v39 }
  0xe3   : > { %653 = vst [vmem:[%s1017_s7 + $0xf0] sm:$0xff] %v621_v40  ;;  %v413_v41 = vpop.f32.mrf.mxu0  ;;  %v437_v42 = vpop.f32.mrf.mxu1 }
  0xe4   : > { %v598_v43 = vadd.f32 %v1010_v48, %v413_v41  ;;  %v606_v44 = vadd.f32 %v1010_v48, %v437_v42 }
  0xe6   : > { %630 = vst [vmem:[%s1017_s7 + $0x38] sm:$0xff] %v598_v43 }
  0xe7   : > { %638 = vst [vmem:[%s1017_s7 + $0x78] sm:$0xff] %v606_v44  ;;  %v461_v45 = vpop.f32.mrf.mxu2  ;;  %v485_v46 = vpop.f32.mrf.mxu3 }
  0xe8   : > { %v614_v47 = vadd.f32 %v1010_v48, %v461_v45  ;;  %v622_v49 = vadd.f32 %v1010_v48, %v485_v46 }
  0xea   : > { %646 = vst [vmem:[%s1017_s7 + $0xb8] sm:$0xff] %v614_v47 }
  0xeb   : > { %654 = vst [vmem:[%s1017_s7 + $0xf8] sm:$0xff] %v622_v49 }
  0xec PF: > { %s13_s14 = sadd.s32 1, %s874_s14   ;;  %s1096_s12 = smov %s870_s13 }
  0xed   : > { %p10_p5 = scmp.ge.s32.totalorder %s13_s14, 4   ;;  %s1097_s13 = smov %s1099_s15 }
  0xef   :  { %12 = sbr.rel (!%p10_p5) target bundleno = 2 (0x2), region = 76 }

</bundles_post_ra>
